<compile_context>
chip_gen: v5e
topology: v5e:2x2
jax: 0.10.0
libtpu: 0.0.40
codegen_flags: <defaults>
</compile_context>

<pallas_src>
import jax
import jax.numpy as jnp
from jax.experimental import pallas as pl
from jax.experimental.pallas import tpu as pltpu


# ----------------------------- Pallas kernel ---------------------------------
def _head_kernel(x_ref, w1_ref, b1_ref, w2_ref, b2_ref, w3_ref, b3_ref,
                 feat_ref, out_ref):
    """Fused bottleneck + fc head (BN folded into w1/b1, spectral norm pre-applied).

    features = ReLU(x @ W1' + b1')                  (BN folded, Dropout -> identity)
    h        = LeakyReLU(features @ W2_sn + b2)     (Dropout -> identity)
    outputs  = h @ W3_sn_padded + b3_padded         (lane-padded to 128, sliced outside)
    """
    x = x_ref[...].astype(w1_ref.dtype)                               # f32 -> bf16 in VMEM
    h = jnp.dot(x, w1_ref[...], preferred_element_type=jnp.float32)   # f32 accumulation
    h = h + b1_ref[...]
    feat = jnp.maximum(h, 0.0)                                         # ReLU
    feat_ref[...] = feat.astype(feat_ref.dtype)                        # bf16 writeback

    h2 = jnp.dot(feat.astype(w2_ref.dtype), w2_ref[...],
                 preferred_element_type=jnp.float32) + b2_ref[...]
    h2 = jnp.where(h2 >= 0.0, h2, 0.01 * h2)                           # LeakyReLU(0.01)
    out = jnp.dot(h2.astype(w3_ref.dtype), w3_ref[...],
                  preferred_element_type=jnp.float32) + b3_ref[...]
    out_ref[...] = out.astype(out_ref.dtype)                           # bf16 writeback


# --------------------- one-time parameter preparation -------------------------
def prepare_params(params, *, compute_dtype=jnp.bfloat16, eps=1e-5):
    """Fold eval-mode BatchNorm into the bottleneck Linear, lane-pad the classifier
    to a dense multiple of 128, and cast weights to bf16 ONCE (not per call)."""
    Din, Db = params["w1"].shape
    n_class = params["w3"].shape[1]

    scale = params["gamma"] * jax.lax.rsqrt(params["rvar"] + eps)          # (1, Db)
    w1 = (params["w1"] * scale).astype(compute_dtype)                      # (Din, Db)
    b1 = (params["b1"] - params["rmean"]) * scale + params["beta"]         # (1, Db) f32

    Np = max(128, ((n_class + 127) // 128) * 128)
    w3 = jnp.zeros((Db, Np), compute_dtype).at[:, :n_class].set(
        params["w3"].astype(compute_dtype))
    b3 = jnp.zeros((1, Np), jnp.float32).at[:, :n_class].set(params["b3"])

    return dict(
        w1=w1, b1=b1,
        w2=params["w2"].astype(compute_dtype), b2=params["b2"],
        w3=w3, b3=b3,
        n_class=n_class,
    )


# ---------------------------- batch-tile selection -----------------------------
def _round_up(x, m):
    return ((x + m - 1) // m) * m


def _pick_tile_b(B, max_tile_b):
    """Pick (tile_b, padded_B).

    - tile_b is a multiple of 16 (bf16 sublane pack) once B > 16
    - >= 2 grid steps when B allows it (keeps both v7x TensorCores busy)
    - largest divisor <= max_tile_b (amortizes ~0.35us/step; power-of-2 batches land
      on 128/256/512-row tiles, which also fills the v5e MXU cleanly)
    """
    if B <= 16:
        Bp = max(8, _round_up(B, 8))
        return Bp, Bp
    Bp = _round_up(B, 16)
    best = 16
    for t in range(16, min(max_tile_b, Bp // 2) + 1, 16):
        if Bp % t == 0:
            best = t
    return best, Bp


# ------------------------------- wrapper --------------------------------------
def model_head(x, prepped, *, max_tile_b=512):
    """x: (B, in_features) float32 features from the basenet.
    prepped: output of prepare_params().  Returns (features, outputs) in bf16."""
    B, Din = x.shape
    w1, b1 = prepped["w1"], prepped["b1"]
    w2, b2 = prepped["w2"], prepped["b2"]
    w3, b3 = prepped["w3"], prepped["b3"]
    n_class = prepped["n_class"]
    Db = w1.shape[1]
    Np = w3.shape[1]
    cdt = w1.dtype

    tile_b, Bp = _pick_tile_b(B, max_tile_b)
    if Bp != B:  # only pay the pad pass when B is actually ragged
        x = jnp.pad(x, ((0, Bp - B), (0, 0)))

    witem = jnp.dtype(cdt).itemsize
    cost = pl.CostEstimate(
        flops=2 * Bp * (Din * Db + Db * Db + Db * Np),
        transcendentals=0,
        bytes_accessed=(x.size * x.dtype.itemsize
                        + (w1.size + w2.size + w3.size) * witem
                        + (b1.size + b2.size + b3.size) * 4
                        + (Bp * Db + Bp * Np) * witem))

    rows = lambda i: (i, 0)   # batch-tiled arrays
    full = lambda i: (0, 0)   # weights: same full block every grid step

    def w_spec(shape):
        # Constant block across the grid -> single-buffered (halves weight VMEM).
        return pl.BlockSpec(shape, full, pipeline_mode=pl.Buffered(buffer_count=1))

    feat, out = pl.pallas_call(
        _head_kernel,
        out_shape=(
            jax.ShapeDtypeStruct((Bp, Db), cdt),
            jax.ShapeDtypeStruct((Bp, Np), cdt),
        ),
        grid_spec=pltpu.PrefetchScalarGridSpec(
            num_scalar_prefetch=0,
            grid=(Bp // tile_b,),
            in_specs=[
                pl.BlockSpec((tile_b, Din), rows),   # x (f32, cast in-kernel)
                w_spec((Din, Db)),                   # w1 (BN folded, bf16)
                w_spec((1, Db)),                     # b1 (BN folded, f32)
                w_spec((Db, Db)),                    # w2 (spectral-normed, bf16)
                w_spec((1, Db)),                     # b2 (f32)
                w_spec((Db, Np)),                    # w3 (spectral-normed, lane-padded)
                w_spec((1, Np)),                     # b3 (lane-padded)
            ],
            out_specs=[
                pl.BlockSpec((tile_b, Db), rows),
                pl.BlockSpec((tile_b, Np), rows),
            ],
        ),
        compiler_params=pltpu.CompilerParams(
            dimension_semantics=("parallel",)),
        cost_estimate=cost,
    )(x, w1, b1, w2, b2, w3, b3)

    return feat[:B], out[:B, :n_class]


# --------------------------- parameter setup (glue) ---------------------------
def spectral_normalize(w, n_iter=10):
    """PyTorch-style spectral norm: divide by largest singular value (power iter)."""
    out_dim = w.shape[1]
    u = jnp.full((out_dim,), 1.0 / jnp.sqrt(out_dim), jnp.float32)
    v = w @ u
    for _ in range(n_iter):
        v = w @ u
        v = v / (jnp.linalg.norm(v) + 1e-12)
        u = w.T @ v
        u = u / (jnp.linalg.norm(u) + 1e-12)
    sigma = v @ (w @ u)
    return w / sigma


def init_params(key, in_features, bottleneck_dim, n_class):
    k1, k2, k3 = jax.random.split(key, 3)
    # bottleneck Linear: weight.normal_(0, 0.005), bias.fill_(0.1)
    w1 = 0.005 * jax.random.normal(k1, (in_features, bottleneck_dim), jnp.float32)
    b1 = jnp.full((1, bottleneck_dim), 0.1, jnp.float32)
    # BatchNorm1d defaults: gamma=1, beta=0, running_mean=0, running_var=1
    gamma = jnp.ones((1, bottleneck_dim), jnp.float32)
    beta = jnp.zeros((1, bottleneck_dim), jnp.float32)
    rmean = jnp.zeros((1, bottleneck_dim), jnp.float32)
    rvar = jnp.ones((1, bottleneck_dim), jnp.float32)
    # fc[0]: sn(Linear(Db, Db)), weight.normal_(0, 0.01), bias 0
    w2 = spectral_normalize(
        0.01 * jax.random.normal(k2, (bottleneck_dim, bottleneck_dim), jnp.float32))
    b2 = jnp.zeros((1, bottleneck_dim), jnp.float32)
    # fc[-1]: sn(Linear(Db, n_class)), weight.normal_(0, 0.01), bias 0
    w3 = spectral_normalize(
        0.01 * jax.random.normal(k3, (bottleneck_dim, n_class), jnp.float32))
    b3 = jnp.zeros((1, n_class), jnp.float32)
    return dict(w1=w1, b1=b1, gamma=gamma, beta=beta, rmean=rmean, rvar=rvar,
                w2=w2, b2=b2, w3=w3, b3=b3)


def reference_head(x, p):
    """Pure-f32 reference with the original (un-folded) semantics."""
    h = x @ p["w1"] + p["b1"]
    h = (h - p["rmean"]) / jnp.sqrt(p["rvar"] + 1e-5) * p["gamma"] + p["beta"]
    feat = jnp.maximum(h, 0.0)
    h2 = feat @ p["w2"] + p["b2"]
    h2 = jnp.where(h2 >= 0.0, h2, 0.01 * h2)
    out = h2 @ p["w3"] + p["b3"]
    return feat, out


# ----------------------------------- main -------------------------------------
if __name__ == "__main__":
    B = 32              # batch (2 grid steps of 16 rows -> both v7x TCs used)
    in_features = 128   # basenet.len_feature()
    bottleneck_dim = 128
    n_class = 16

    key = jax.random.PRNGKey(0)
    kx, kp = jax.random.split(key)
    x = jax.random.normal(kx, (B, in_features), jnp.float32)   # basenet features
    params = init_params(kp, in_features, bottleneck_dim, n_class)

    prepped = prepare_params(params)   # one-time: BN fold + lane-pad + bf16 cast
    feat, out = model_head(x, prepped)
    jax.block_until_ready((feat, out))

    feat_ref, out_ref = reference_head(x, params)
    assert feat.shape == feat_ref.shape and out.shape == (B, n_class)
    # bf16 matmul inputs / bf16 outputs with f32 accumulation -> loosened tolerances
    assert jnp.allclose(feat.astype(jnp.float32), feat_ref, atol=1e-2, rtol=5e-2)
    assert jnp.allclose(out.astype(jnp.float32), out_ref, atol=1e-2, rtol=5e-2)
    print("KERNEL_OK")
</pallas_src>

<mosaic_0001>
module attributes {stable_mosaic.version = 11 : i64} {
  func.func @_head_kernel(%arg0: i32, %arg1: memref<16x128xf32, #tpu.memory_space<vmem>>, %arg2: memref<128x128xbf16, #tpu.memory_space<vmem>>, %arg3: memref<1x128xf32, #tpu.memory_space<vmem>>, %arg4: memref<128x128xbf16, #tpu.memory_space<vmem>>, %arg5: memref<1x128xf32, #tpu.memory_space<vmem>>, %arg6: memref<128x128xbf16, #tpu.memory_space<vmem>>, %arg7: memref<1x128xf32, #tpu.memory_space<vmem>>, %arg8: memref<16x128xbf16, #tpu.memory_space<vmem>>, %arg9: memref<16x128xbf16, #tpu.memory_space<vmem>>) attributes {dimension_semantics = [#tpu.dimension_semantics<parallel>], iteration_bounds = array<i64: 2>, scalar_prefetch = 0 : i64, scratch_operands = 0 : i64, tpu.core_type = #tpu.core_type<tc>, window_params = [{transform_indices = @transform_0, window_bounds = array<i64: 16, 128>}, {pipeline_mode = #tpu.pipeline_mode<synchronous>, transform_indices = @transform_1, window_bounds = array<i64: 128, 128>}, {pipeline_mode = #tpu.pipeline_mode<synchronous>, transform_indices = @transform_2, window_bounds = array<i64: 1, 128>}, {pipeline_mode = #tpu.pipeline_mode<synchronous>, transform_indices = @transform_3, window_bounds = array<i64: 128, 128>}, {pipeline_mode = #tpu.pipeline_mode<synchronous>, transform_indices = @transform_4, window_bounds = array<i64: 1, 128>}, {pipeline_mode = #tpu.pipeline_mode<synchronous>, transform_indices = @transform_5, window_bounds = array<i64: 128, 128>}, {pipeline_mode = #tpu.pipeline_mode<synchronous>, transform_indices = @transform_6, window_bounds = array<i64: 1, 128>}, {transform_indices = @transform_7, window_bounds = array<i64: 16, 128>}, {transform_indices = @transform_8, window_bounds = array<i64: 16, 128>}]} {
    %c0 = arith.constant 0 : index
    %c0_0 = arith.constant 0 : index
    %0 = vector.load %arg1[%c0, %c0_0] : memref<16x128xf32, #tpu.memory_space<vmem>>, vector<16x128xf32>
    %1 = arith.truncf %0 : vector<16x128xf32> to vector<16x128xbf16>
    %c0_1 = arith.constant 0 : index
    %c0_2 = arith.constant 0 : index
    %2 = vector.load %arg2[%c0_1, %c0_2] : memref<128x128xbf16, #tpu.memory_space<vmem>>, vector<128x128xbf16>
    %cst = arith.constant dense<0.000000e+00> : vector<16x128xf32>
    %3 = tpu.matmul %1, %2, %cst {dimension_numbers = #tpu.dot_dimension_numbers<[1], [0], [0], [1], [0, 0, 1, 1], [], []>} : vector<16x128xbf16>, vector<128x128xbf16>, vector<16x128xf32> -> vector<16x128xf32>
    %c0_3 = arith.constant 0 : index
    %c0_4 = arith.constant 0 : index
    %4 = vector.load %arg3[%c0_3, %c0_4] : memref<1x128xf32, #tpu.memory_space<vmem>>, vector<1x128xf32>
    %5 = vector.broadcast %4 : vector<1x128xf32> to vector<16x128xf32>
    %6 = arith.addf %3, %5 : vector<16x128xf32>
    %cst_5 = arith.constant 0.000000e+00 : f32
    %7 = vector.broadcast %cst_5 : f32 to vector<16x128xf32>
    %8 = arith.maximumf %6, %7 : vector<16x128xf32>
    %9 = arith.truncf %8 : vector<16x128xf32> to vector<16x128xbf16>
    %c0_6 = arith.constant 0 : index
    %c0_7 = arith.constant 0 : index
    %10 = vector.load %arg8[%c0_6, %c0_7] : memref<16x128xbf16, #tpu.memory_space<vmem>>, vector<16x128xbf16>
    tpu.vector_store %arg8[%c0_6, %c0_7], %9 {strides = array<i32>} : memref<16x128xbf16, #tpu.memory_space<vmem>>, vector<16x128xbf16>,
    %11 = arith.truncf %8 : vector<16x128xf32> to vector<16x128xbf16>
    %c0_8 = arith.constant 0 : index
    %c0_9 = arith.constant 0 : index
    %12 = vector.load %arg4[%c0_8, %c0_9] : memref<128x128xbf16, #tpu.memory_space<vmem>>, vector<128x128xbf16>
    %cst_10 = arith.constant dense<0.000000e+00> : vector<16x128xf32>
    %13 = tpu.matmul %11, %12, %cst_10 {dimension_numbers = #tpu.dot_dimension_numbers<[1], [0], [0], [1], [0, 0, 1, 1], [], []>} : vector<16x128xbf16>, vector<128x128xbf16>, vector<16x128xf32> -> vector<16x128xf32>
    %c0_11 = arith.constant 0 : index
    %c0_12 = arith.constant 0 : index
    %14 = vector.load %arg5[%c0_11, %c0_12] : memref<1x128xf32, #tpu.memory_space<vmem>>, vector<1x128xf32>
    %15 = vector.broadcast %14 : vector<1x128xf32> to vector<16x128xf32>
    %16 = arith.addf %13, %15 : vector<16x128xf32>
    %cst_13 = arith.constant 0.000000e+00 : f32
    %17 = vector.broadcast %cst_13 : f32 to vector<16x128xf32>
    %18 = arith.cmpf oge, %16, %17 : vector<16x128xf32>
    %cst_14 = arith.constant 0.00999999977 : f32
    %19 = vector.broadcast %cst_14 : f32 to vector<16x128xf32>
    %20 = arith.mulf %19, %16 : vector<16x128xf32>
    %21 = arith.select %18, %16, %20 : vector<16x128xi1>, vector<16x128xf32>
    %22 = arith.truncf %21 : vector<16x128xf32> to vector<16x128xbf16>
    %c0_15 = arith.constant 0 : index
    %c0_16 = arith.constant 0 : index
    %23 = vector.load %arg6[%c0_15, %c0_16] : memref<128x128xbf16, #tpu.memory_space<vmem>>, vector<128x128xbf16>
    %cst_17 = arith.constant dense<0.000000e+00> : vector<16x128xf32>
    %24 = tpu.matmul %22, %23, %cst_17 {dimension_numbers = #tpu.dot_dimension_numbers<[1], [0], [0], [1], [0, 0, 1, 1], [], []>} : vector<16x128xbf16>, vector<128x128xbf16>, vector<16x128xf32> -> vector<16x128xf32>
    %c0_18 = arith.constant 0 : index
    %c0_19 = arith.constant 0 : index
    %25 = vector.load %arg7[%c0_18, %c0_19] : memref<1x128xf32, #tpu.memory_space<vmem>>, vector<1x128xf32>
    %26 = vector.broadcast %25 : vector<1x128xf32> to vector<16x128xf32>
    %27 = arith.addf %24, %26 : vector<16x128xf32>
    %28 = arith.truncf %27 : vector<16x128xf32> to vector<16x128xbf16>
    %c0_20 = arith.constant 0 : index
    %c0_21 = arith.constant 0 : index
    %29 = vector.load %arg9[%c0_20, %c0_21] : memref<16x128xbf16, #tpu.memory_space<vmem>>, vector<16x128xbf16>
    tpu.vector_store %arg9[%c0_20, %c0_21], %28 {strides = array<i32>} : memref<16x128xbf16, #tpu.memory_space<vmem>>, vector<16x128xbf16>,
    return
  }
  func.func @transform_0(%arg0: i32) -> (i32, i32) {
    %c0_i32 = arith.constant 0 : i32
    %c0_i32_0 = arith.constant 0 : i32
    return %arg0, %c0_i32 : i32, i32
  }
  func.func @transform_1(%arg0: i32) -> (i32, i32) {
    %c0_i32 = arith.constant 0 : i32
    %c0_i32_0 = arith.constant 0 : i32
    %c0_i32_1 = arith.constant 0 : i32
    return %c0_i32, %c0_i32_0 : i32, i32
  }
  func.func @transform_2(%arg0: i32) -> (i32, i32) {
    %c0_i32 = arith.constant 0 : i32
    %c0_i32_0 = arith.constant 0 : i32
    %c0_i32_1 = arith.constant 0 : i32
    return %c0_i32, %c0_i32_0 : i32, i32
  }
  func.func @transform_3(%arg0: i32) -> (i32, i32) {
    %c0_i32 = arith.constant 0 : i32
    %c0_i32_0 = arith.constant 0 : i32
    %c0_i32_1 = arith.constant 0 : i32
    return %c0_i32, %c0_i32_0 : i32, i32
  }
  func.func @transform_4(%arg0: i32) -> (i32, i32) {
    %c0_i32 = arith.constant 0 : i32
    %c0_i32_0 = arith.constant 0 : i32
    %c0_i32_1 = arith.constant 0 : i32
    return %c0_i32, %c0_i32_0 : i32, i32
  }
  func.func @transform_5(%arg0: i32) -> (i32, i32) {
    %c0_i32 = arith.constant 0 : i32
    %c0_i32_0 = arith.constant 0 : i32
    %c0_i32_1 = arith.constant 0 : i32
    return %c0_i32, %c0_i32_0 : i32, i32
  }
  func.func @transform_6(%arg0: i32) -> (i32, i32) {
    %c0_i32 = arith.constant 0 : i32
    %c0_i32_0 = arith.constant 0 : i32
    %c0_i32_1 = arith.constant 0 : i32
    return %c0_i32, %c0_i32_0 : i32, i32
  }
  func.func @transform_7(%arg0: i32) -> (i32, i32) {
    %c0_i32 = arith.constant 0 : i32
    %c0_i32_0 = arith.constant 0 : i32
    return %arg0, %c0_i32 : i32, i32
  }
  func.func @transform_8(%arg0: i32) -> (i32, i32) {
    %c0_i32 = arith.constant 0 : i32
    %c0_i32_0 = arith.constant 0 : i32
    return %arg0, %c0_i32 : i32, i32
  }
}

</mosaic_0001>

<bundles_post_ra>
// kernel: tpu_custom_call.1
= control target key start
LH: loop header
LB: loop body
LE: loop exit
PB: predicated region body
PF: predicated region fallthrough
CT: control target
= control target key end

     0   :  { %s1563_s0 = inlined_call_operand.hbm [shape: f32[32,128], index: 0, kind: input, shape index: {}]   ;;  %s1564_s1 = inlined_call_operand.hbm [shape: bf16[128,128], index: 1, kind: input, shape index: {}]   ;;  %s1565_s2 = inlined_call_operand.vmem [shape: f32[1,128], index: 2, kind: input, shape index: {}]   ;;  %s1566_s3 = inlined_call_operand.hbm [shape: bf16[128,128], index: 3, kind: input, shape index: {}]   ;;  %s1567_s4 = inlined_call_operand.vmem [shape: f32[1,128], index: 4, kind: input, shape index: {}]   ;;  %s1568_s5 = inlined_call_operand.hbm [shape: bf16[128,128], index: 5, kind: input, shape index: {}]   ;;  %s1569_s6 = inlined_call_operand.vmem [shape: f32[1,128], index: 6, kind: input, shape index: {}]   ;;  %s1570_s7 = inlined_call_operand.hbm [shape: bf16[32,128], index: 7, kind: output, shape index: {0}]   ;;  %s1571_s8 = inlined_call_operand.hbm [shape: bf16[32,128], index: 8, kind: output, shape index: {1}]  }
   0x1   :  { %1572 = sst [smem:[#allocation18_spill]] %s1564_s1 }
   0x2   :  { %1573 = sst [smem:[#allocation19_spill]] %s1566_s3 }
   0x3   :  { %14 = vsyncpa [#allocation3], 0 }
   0x4   :  { %16 = vsyncpa [#allocation3 + $0x1], 0 }
   0x5   :  { %17 = vsyncpa [#allocation6], 0 }
   0x6   :  { %18 = vsyncpa [#allocation9], 0 }
   0x7   :  { %19 = vsyncpa [#allocation4], 0 }
   0x8   :  { %21 = vsyncpa [#allocation4 + $0x1], 0 }
   0x9   :  { %22 = vsyncpa [#allocation12], 0 }
   0xa   :  { %24 = vsyncpa [#allocation12 + $0x1], 0  ;;  %s1365_s27 = smov 0   ;;  %s1367_s28 = smov 0  }
   0xb   :  { %s1369_s29 = smov 0   ;;  %s1371_s30 = smov 0  }
   0xc LB: > { %s1386_s9 = sadd.s32 4294967295, %s1309_s30   ;;  %s835_s10 = sadd.s32 4294967294, %s1309_s30   ;;  %s1309_s30 = sphi %s1371_s30, %s1586_s30   ;;  %s1305_s29 = sphi %s1369_s29, %s1585_s29   ;;  %s1301_s28 = sphi %s1367_s28, %s1584_s28   ;;  %s1297_s27 = sphi %s1365_s27, %s1583_s27  }
   0xd   : > { %p50_p0 = scmp.ne.s32.totalorder %s1301_s28, %s1297_s27  ;;  %p51_p1 = scmp.eq.s32.totalorder %s1386_s9, 0 }
   0xe   : > { %p200_p2 = scmp.eq.s32.totalorder %s1386_s9, 1  ;;  %p206_p3 = scmp.eq.s32.totalorder %s835_s10, 1 }
   0xf   : > { %p1395_p4 = por %p51_p1, %p50_p0  ;;  %p836_p5 = scmp.ge.s32.totalorder %s1309_s30, 1 }
  0x10   : > { %p1400_p6 = por %p206_p3, %p50_p0  ;;  %p239_p7 = scmp.lt.s32.totalorder %s1309_s30, 3 }
  0x11   : > { %s1576_s1 = sld [smem:[#allocation18_spill]]  ;;  %s1311_s17 = smov [#allocation5]  }
  0x12   : > { %p1408_p8 = pnand %p836_p5, %p239_p7  ;;  %s252_s18 = sshll.u32 %s1311_s17, 4  ;;  %s253_s18 = int_to_ptr.vmem [resolvable:$true] %s252_s18 }
  0x13   : > { %s1579_s3 = sld [smem:[#allocation19_spill]]  ;;  %s1312_s23 = smov 64  }
  0x14   : > { %p1010_p9 = pneg %p1408_p8  ;;  %s1313_s24 = smov 4  }
  0x15   : > { %s1314_s25 = smov [#allocation7]   ;;  %s284_s14 = sshll.u32 %s1568_s5, 4  ;;  %s285_s14 = int_to_ptr.hbm [resolvable:$true] %s284_s14 }
  0x16   : > { %p1416_p10 = pnand %p1010_p9, %p51_p1  ;;  %s269_s26 = sshll.u32 %s1314_s25, 4  ;;  %s270_s26 = int_to_ptr.vmem [resolvable:$true] %s269_s26 }
  0x17   : > { %s250_s15 = sshll.u32 %s1576_s1, 4  ;;  %s1315_s17 = smov [#allocation8]   ;;  %s251_s15 = int_to_ptr.hbm [resolvable:$true] %s250_s15 }
  0x18   : > { %1013 = dma.hbm_to_vmem [thread:$0]  (!%p1416_p10), %s251_s15, 1024, %s253_s18, [#allocation6], %s1312_s23, %s1312_s23, %s1313_s24  }
  0x19   : > { %s267_s22 = sshll.u32 %s1579_s3, 4  ;;  %s286_s20 = sshll.u32 %s1315_s17, 4  ;;  %s268_s22 = int_to_ptr.hbm [resolvable:$true] %s267_s22  ;;  %s287_s20 = int_to_ptr.vmem [resolvable:$true] %s286_s20 }
  0x1a   : > { %1016 = dma.hbm_to_vmem [thread:$0]  (!%p1416_p10), %s268_s22, 1024, %s270_s26, [#allocation6], %s1312_s23, %s1312_s23, %s1313_s24  }
  0x1b   : > { %s1432_s15 = sadd.s32 1, %s1309_s30   ;;  %s37_s21 = sadd.s32 1, %s1305_s29 }
  0x1c   : > { %1019 = dma.hbm_to_vmem [thread:$0]  (!%p1416_p10), %s285_s14, 1024, %s287_s20, [#allocation9], %s1312_s23, %s1312_s23, %s1313_s24  }
  0x1d   : > { %s34_s18 = ssub.s32 %s1309_s30, %s1432_s15  ;;  %p44_p13 = scmp.ne.s32.totalorder %s1305_s29, %s1301_s28 }
  0x1e   : > { %p35_p12 = scmp.eq.s32.totalorder %s34_s18, 0  ;;  %p45_p0 = scmp.eq.s32.totalorder %s1309_s30, 0 }
  0x1f   : > { %p1034_p3 = scmp.lt.s32.totalorder %s1309_s30, 2  ;;  %p1448_p7 = por %p200_p2, %p44_p13 }
  0x20   : > { %s1444_s25 = scalar_select %p35_p12, %s1305_s29, %s37_s21  }
  0x21   : > { %p46_p5 = por %p45_p0, %p44_p13  ;;  %s303_s26 = sand.u32 1, %s1305_s29  }
  0x22   : > { %s955_s10 = sshll.u32 %s1309_s30, 4  ;;  %s841_s19 = sshll.u32 %s303_s26, 4 }
  0x23   : > { %s312_s24 = scalar_lea.hbm %s1563_s0, %s955_s10  ;;  %s307_s17 = scalar_lea.vmem [#allocation2], %s841_s19 }
  0x24   : > { %s313_s14 = sshll.u32 %s312_s24, 4  ;;  %s315_s20 = sshll.u32 %s307_s17, 4  ;;  %s314_s14 = int_to_ptr.hbm [resolvable:$true] %s313_s14  ;;  %s316_s20 = int_to_ptr.vmem [resolvable:$true] %s315_s20 }
  0x25   : > { %p1459_p9 = pnand %p1034_p3, %p46_p5  ;;  %s304_s21 = scalar_lea.sflag [#allocation3], %s303_s26 }
  0x26   : > { %s1173_s1 = sshra.s32 %s314_s14, 4  ;;  %s1180_s13 = scalar_lea.hbm %s1563_s0, 32  ;;  %s1174_s1 = int_to_ptr.hbm [resolvable:$true] %s1173_s1 }
  0x27   : > { %s1175_s3 = scalar_lea.hbm %s1174_s1, 16  ;;  %p1177_p10 = pneg %p1459_p9 }
  0x28   : > { %p1176_p2 = scmp.ne.s32.totalorder %s1174_s1, %s1175_s3  ;;  %p1181_p0 = scmp.lt.s32.totalorder %s1174_s1, %s1563_s0 }
  0x29   : > { %p1182_p3 = scmp.lt.s32.totalorder %s1180_s13, %s1175_s3 }
  0x2a   : > { %p1178_p12 = pnand %p1177_p10, %p1176_p2 }
  0x2b   : > { %p1183_p5 = por %p1182_p3, %p1181_p0 }
  0x2c   : > { %p1179_p13 = pneg %p1178_p12 }
  0x2e   : > { %p1184_p11 = pnand %p1183_p5, %p1179_p13 }
  0x30   : > { %1187 = shalt.err (!%p1184_p11)
}
  0x31   : > { %s1316_s26 = smov 128   ;;  %s1317_s17 = smov 8  }
  0x32   : > { %1023 = dma.hbm_to_vmem [thread:$0]  (!%p1459_p9), %s314_s14, 256, %s316_s20, %s304_s21, %s1316_s26, %s1316_s26, %s1317_s17  }
  0x33   : > { %327 = sbr.rel (%p1408_p8) target bundleno = 525 (0x20d), region = 48  ;;  %s1476_s10 = sand.u32 (!%p1408_p8), 1, %s1301_s28  }
  0x34   : > { %s845_s19 = sshll.u32 (!%p1408_p8), %s1476_s10, 4  ;;  %s330_s1 = scalar_lea.sflag (!%p1408_p8), [#allocation3], %s1476_s10 }
  0x35   : > { %s333_s3 = scalar_lea.vmem (!%p1408_p8), [#allocation2], %s845_s19 }
  0x38   : > { %1276 = dma.done.wait (%p1395_p4), %s330_s1, 256  }
  0x39   : > { %1278 = vsyncadd (%p1395_p4), %s330_s1, 4294967040 }
  0x3a   : > { %1280 = dma.done.wait (%p51_p1), [#allocation6], 2048  }
  0x3b   : > { %1282 = vsyncadd (%p51_p1), [#allocation6], 4294965248 }
  0x3c   : > { %1284 = dma.done.wait (%p51_p1), [#allocation9], 1024  }
  0x3d   : > { %1286 = vsyncadd (%p51_p1), [#allocation9], 4294966272  ;;  %v963_v0 = vld [vmem:[#allocation5 + $0x38] sm:$0xff]  ;;  %v962_v1 = vld [vmem:[#allocation5 + $0x30] sm:$0xff]  ;;  %s849_s14 = sshll.u32 %s1476_s10, 3  ;;  %s980_s23 = sshll.u32 %s1386_s9, 3 }
  0x3e   : > { %461 = vmatpush.bf16.msra.mxu0 %v963_v0  ;;  %v971_v2 = vld [vmem:[#allocation7 + $0x38] sm:$0xff]  ;;  %v970_v3 = vld [vmem:[#allocation7 + $0x30] sm:$0xff]  ;;  %v961_v4 = vld [vmem:[#allocation5 + $0x28] sm:$0xff]  ;;  %s1498_s20 = scalar_lea.vmem [#allocation10], %s849_s14  ;;  %s679_s17 = scalar_lea.hbm %s1570_s7, %s980_s23 }
  0x3f   : > { %555 = vmatpush.bf16.msra.mxu1 %v971_v2  ;;  %v969_v5 = vld [vmem:[#allocation7 + $0x28] sm:$0xff]  ;;  %v960_v6 = vld [vmem:[#allocation5 + $0x20] sm:$0xff]  ;;  %v959_v7 = vld [vmem:[#allocation5 + $0x18] sm:$0xff]  ;;  %s680_s13 = sshll.u32 %s1498_s20, 4  ;;  %s682_s19 = sshll.u32 %s679_s17, 4  ;;  %s681_s13 = int_to_ptr.vmem [resolvable:$true] %s680_s13  ;;  %s683_s19 = int_to_ptr.hbm [resolvable:$true] %s682_s19 }
  0x40   : > { %v958_v8 = vld [vmem:[#allocation5 + $0x10] sm:$0xff]  ;;  %v957_v9 = vld [vmem:[#allocation5 + $0x8] sm:$0xff]  ;;  %v956_v10 = vld [vmem:[#allocation5] sm:$0xff]  ;;  %s663_s1 = scalar_lea.sflag [#allocation4], %s1476_s10 }
  0x41   : > { %v390_v11 = vld [vmem:[%s333_s3] sm:$0xff]  ;;  %v391_v12 = vld [vmem:[%s333_s3 + $0x8] sm:$0xff]  ;;  %s1217_s3 = sshra.s32 %s683_s19, 4  ;;  %s1218_s3 = int_to_ptr.hbm [resolvable:$true] %s1217_s3 }
  0x42   : > { %462 = vmatpush.bf16.msra.mxu0 %v962_v1  ;;  %v392_v13 = vpack.c.bf16 %v391_v12, %v390_v11  ;;  %v968_v14 = vld [vmem:[#allocation7 + $0x20] sm:$0xff]  ;;  %v967_v15 = vld [vmem:[#allocation7 + $0x18] sm:$0xff]  ;;  %v966_v16 = vld [vmem:[#allocation7 + $0x10] sm:$0xff]  ;;  %s1219_s11 = scalar_lea.hbm %s1218_s3, 8  ;;  %p1224_p11 = scmp.lt.s32.totalorder %s1218_s3, %s1570_s7 }
  0x43   : > { %556 = vmatpush.bf16.msra.mxu1 %v970_v3  ;;  %v965_v17 = vld [vmem:[#allocation7 + $0x8] sm:$0xff]  ;;  %v964_v18 = vld [vmem:[#allocation7] sm:$0xff]  ;;  %v979_v19 = vld [vmem:[#allocation8 + $0x38] sm:$0xff]  ;;  %p1220_p1 = scmp.ne.s32.totalorder %s1218_s3, %s1219_s11 }
  0x44   : > { %644 = vmatpush.bf16.msra.mxu2 %v979_v19  ;;  %v978_v20 = vld [vmem:[#allocation8 + $0x30] sm:$0xff]  ;;  %v977_v21 = vld [vmem:[#allocation8 + $0x28] sm:$0xff]  ;;  %v976_v22 = vld [vmem:[#allocation8 + $0x20] sm:$0xff] }
  0x45   : > { %v1080_v23 = vld [vmem:[%s1565_s2] ss:$0 sm:$0xff]  ;;  %v975_v36 = vld [vmem:[#allocation8 + $0x18] sm:$0xff]  ;;  %v974_v37 = vld [vmem:[#allocation8 + $0x10] sm:$0xff]  ;;  %p1221_p4 = pnand %p1220_p1, %p1448_p7 }
  0x46   : > { %463 = vmatpush.bf16.msra.mxu0 %v961_v4  ;;  %v973_v38 = vld [vmem:[#allocation8 + $0x8] sm:$0xff]  ;;  %v972_v39 = vld [vmem:[#allocation8] sm:$0xff] }
  0x47   : > { %557 = vmatpush.bf16.msra.mxu1 %v969_v5  ;;  %v1081_v41 = vld [vmem:[%s1567_s4] ss:$0 sm:$0xff]  ;;  %p1222_p8 = pneg %p1221_p4 }
  0x48   : > { %645 = vmatpush.bf16.msra.mxu2 %v978_v20 }
  0x4a   : > { %464 = vmatpush.bf16.msra.mxu0 %v960_v6 }
  0x4b   : > { %558 = vmatpush.bf16.msra.mxu1 %v968_v14 }
  0x4c   : > { %646 = vmatpush.bf16.msra.mxu2 %v977_v21 }
  0x4e   : > { %465 = vmatpush.bf16.msra.mxu0 %v959_v7 }
  0x4f   : > { %559 = vmatpush.bf16.msra.mxu1 %v967_v15 }
  0x50   : > { %647 = vmatpush.bf16.msra.mxu2 %v976_v22 }
  0x52   : > { %466 = vmatpush.bf16.msra.mxu0 %v958_v8 }
  0x53   : > { %560 = vmatpush.bf16.msra.mxu1 %v966_v16 }
  0x54   : > { %648 = vmatpush.bf16.msra.mxu2 %v975_v36 }
  0x56   : > { %467 = vmatpush.bf16.msra.mxu0 %v957_v9 }
  0x57   : > { %561 = vmatpush.bf16.msra.mxu1 %v965_v17 }
  0x58   : > { %649 = vmatpush.bf16.msra.mxu2 %v974_v37 }
  0x5a   : > { %468 = vmatpush.bf16.msra.mxu0 %v956_v10 }
  0x5b   : > { %562 = vmatpush.bf16.msra.mxu1 %v964_v18 }
  0x5c   : > { %650 = vmatpush.bf16.msra.mxu2 %v973_v38 }
  0x5d   : > { %469 = vmatmul.bf16.vlgmr.msra.gmra.mxu0 %v392_v13 }
  0x60   : > { %651 = vmatpush.bf16.msra.mxu2 %v972_v39 }
  0xda   : > { %v470_v24 = vpop.f32.mrf.mxu0 }
  0xdb   : > { %v471_v25 = vadd.f32 %v1080_v23, %v470_v24 }
  0xdd   : > { %v475_v26 = vmax.f32 %v471_v25, 0.0 }
  0xdf   : > { %v477_v29 = vpack.c.bf16 %v475_v26, %v475_v26 }
  0xe1   : > { %v503_v33 = vunpack.c.l.b16 %v477_v29 }
  0xe2   : > { %v472_v27 = vpop.f32.mrf.mxu0 }
  0xe3   : > { %v473_v28 = vadd.f32 %v1080_v23, %v472_v27 }
  0xe5   : > { %v476_v30 = vmax.f32 %v473_v28, 0.0 }
  0xe7   : > { %v478_v31 = vpack.c.bf16 %v476_v30, %v476_v30  ;;  %v985_v32 = vpack.c.bf16 %v476_v30, %v475_v26 }
  0xe9   : > { %986 = vst [vmem:[%s1498_s20] sm:$0xff] %v985_v32   ;;  %v504_v34 = vunpack.c.l.b16 %v478_v31  ;;  %s1223_s20 = scalar_lea.hbm %s1570_s7, 16 }
  0xea   : > { %p1225_p9 = scmp.lt.s32.totalorder %s1223_s20, %s1219_s11 }
  0xeb   : > { %v505_v35 = vpack.c.b16 %v504_v34, %v503_v33 }
  0xec   : > { %p1226_p2 = por %p1225_p9, %p1224_p11 }
  0xed   : > { %563 = vmatmul.bf16.vlgmr.msra.gmra.mxu1 %v505_v35 }
  0xee   : > { %p1227_p10 = pnand %p1226_p2, %p1222_p8 }
 0x16a   : > { %v564_v40 = vpop.f32.mrf.mxu1 }
 0x16b   : > { %v565_v42 = vadd.f32 %v1081_v41, %v564_v40 }
 0x16d   : > { %v571_v44 = vmul.f32 0.01, %v565_v42  ;;  %vm569_vm0 = vcmp.ge.f32.partialorder %v565_v42, 0.0 }
 0x16f   : > { %v573_v47 = vsel %vm569_vm0, %v565_v42, %v571_v44 }
 0x172   : > { %v566_v43 = vpop.f32.mrf.mxu1 }
 0x173   : > { %v567_v45 = vadd.f32 %v1081_v41, %v566_v43 }
 0x175   : > { %v572_v46 = vmul.f32 0.01, %v567_v45  ;;  %vm570_vm1 = vcmp.ge.f32.partialorder %v567_v45, 0.0 }
 0x177   : > { %v574_v48 = vsel %vm570_vm1, %v567_v45, %v572_v46 }
 0x178   : > { %v575_v49 = vpack.c.bf16 %v574_v48, %v573_v47 }
 0x17a   : > { %652 = vmatmul.bf16.vlgmr.msra.gmra.mxu2 %v575_v49 }
 0x17b   : > { %1230 = shalt.err (!%p1227_p10)
}
 0x17c   : > { %s1318_s24 = smov 64   ;;  %s1319_s26 = smov 4   ;;  %v1082_v51 = vld [vmem:[%s1569_s6] ss:$0 sm:$0xff] }
 0x17d   : > { %1006 = dma.vmem_to_hbm [thread:$0]  (%p1448_p7), %s681_s13, 128, %s683_s19, %s663_s1, %s1318_s24, %s1318_s24, %s1319_s26  }
 0x17e   : > { %s696_s18 = scalar_lea.hbm %s1571_s8, %s980_s23  ;;  %s386_s20 = scalar_lea.vmem [#allocation11], %s849_s14 }
 0x17f   : > { %s697_s9 = sshll.u32 %s386_s20, 4  ;;  %s699_s21 = sshll.u32 %s696_s18, 4  ;;  %s698_s9 = int_to_ptr.vmem [resolvable:$true] %s697_s9  ;;  %s700_s21 = int_to_ptr.hbm [resolvable:$true] %s699_s21 }
 0x180   : > { %s668_s13 = scalar_lea.sflag [#allocation12], %s1476_s10  ;;  %s1245_s19 = sshra.s32 %s700_s21, 4  ;;  %s1246_s19 = int_to_ptr.hbm [resolvable:$true] %s1245_s19 }
 0x181   : > { %s1247_s1 = scalar_lea.hbm %s1246_s19, 8  ;;  %s1251_s14 = scalar_lea.hbm %s1571_s8, 16 }
 0x182   : > { %p1248_p12 = scmp.ne.s32.totalorder %s1246_s19, %s1247_s1  ;;  %p1252_p3 = scmp.lt.s32.totalorder %s1246_s19, %s1571_s8 }
 0x183   : > { %p1253_p5 = scmp.lt.s32.totalorder %s1251_s14, %s1247_s1 }
 0x184   : > { %p1249_p13 = pnand %p1248_p12, %p1448_p7 }
 0x185   : > { %p1254_p1 = por %p1253_p5, %p1252_p3 }
 0x186   : > { %p1250_p0 = pneg %p1249_p13 }
 0x188   : > { %p1255_p4 = pnand %p1254_p1, %p1250_p0 }
 0x1fd   : > { %v653_v50 = vpop.f32.mrf.mxu2 }
 0x1fe   : > { %v654_v53 = vadd.f32 %v1082_v51, %v653_v50 }
 0x205   : > { %v655_v52 = vpop.f32.mrf.mxu2 }
 0x206   : > { %v656_v54 = vadd.f32 %v1082_v51, %v655_v52 }
 0x208   : > { %v990_v55 = vpack.c.bf16 %v656_v54, %v654_v53 }
 0x20a   : > { %991 = vst [vmem:[%s386_s20] sm:$0xff] %v990_v55  }
 0x20b   : > { %1258 = shalt.err (!%p1255_p4)
}
 0x20c   : > { %1007 = dma.vmem_to_hbm [thread:$0]  (%p1448_p7), %s698_s9, 128, %s700_s21, %s668_s13, %s1318_s24, %s1318_s24, %s1319_s26  }
 0x20d PF: > { %s714_s10 = sand.u32 1, %s1297_s27   ;;  %p1582_p8 = scmp.ge.s32.totalorder %s1309_s30, 2 }
 0x20e   : > { %s715_s11 = scalar_lea.sflag [#allocation4], %s714_s10 }
 0x20f   : > { %p1025_p11 = pnand %p1582_p8, %p1400_p6 }
 0x211   : > { %p1026_p9 = pneg %p1025_p11 }
 0x213   : > { %1288 = dma.done.wait (%p1026_p9), %s715_s11, 128  }
 0x214   : > { %1290 = vsyncadd (%p1026_p9), %s715_s11, 4294967168  ;;  %s725_s18 = scalar_lea.sflag [#allocation12], %s714_s10 }
 0x215   : > { %1292 = dma.done.wait (%p1026_p9), %s725_s18, 128  }
 0x216   : > { %1294 = vsyncadd (%p1026_p9), %s725_s18, 4294967168  ;;  %p27_p7 = scmp.ge.s32.totalorder %s1432_s15, 4   ;;  %s1583_s27 = smov %s1301_s28 }
 0x217   : > { %s1584_s28 = smov %s1305_s29  ;;  %s1585_s29 = smov %s1444_s25 }
 0x218   : > { %s1586_s30 = smov %s1432_s15  ;;  %29 = sbr.rel (!%p27_p7) target bundleno = 12 (0xc), region = 122 }
 0x21d   :  { %731 = vsyncpa [#allocation3], 1 }
 0x21e   :  { %733 = vsyncpa [#allocation3 + $0x1], 1 }
 0x21f   :  { %734 = vsyncpa [#allocation6], 1 }
 0x220   :  { %735 = vsyncpa [#allocation9], 1 }
 0x221   :  { %736 = vsyncpa [#allocation4], 1 }
 0x222   :  { %738 = vsyncpa [#allocation4 + $0x1], 1 }
 0x223   :  { %739 = vsyncpa [#allocation12], 1 }
 0x224   :  { %741 = vsyncpa [#allocation12 + $0x1], 1 }

</bundles_post_ra>
